<compile_context>
chip_gen: v7x
topology: tpu7x:2x2x1
jax: 0.10.0
libtpu: 0.0.40
codegen_flags: <defaults>
</compile_context>

<pallas_src>
import jax
import jax.numpy as jnp
from jax.experimental import pallas as pl
from jax.experimental.pallas import tpu as pltpu


def _round_up(v, m):
    return ((v + m - 1) // m) * m


# --------------------------------------------------------------------------- #
# Kernel
# --------------------------------------------------------------------------- #
def encoder_totalvi_kernel(
    # batch-tiled inputs
    x_ref, cat_ref, eps_ref,
    # VMEM-resident packed parameters (grid-invariant)
    w0_ref, sh0_ref, wc_ref, w1_ref, sh1_ref, wh_ref, bh_ref,
    # single lane-dense output slab
    out_ref,
):
    tb = x_ref.shape[0]
    nh = w1_ref.shape[0]             # n_hidden
    nz = eps_ref.shape[-1] - 1       # n_output (last eps lane is the l-noise)
    ncat = wc_ref.shape[0]           # padded categorical width

    # ---- categorical covariate: in-kernel one-hot + one small MXU pass ------
    # (replaces torch.cat(one_hot, dim=-1) + the covariate columns of each
    #  Linear; BatchNorm scale already folded into wc host-side)
    oh = (jax.lax.broadcasted_iota(jnp.int32, (tb, ncat), 1)
          == cat_ref[...]).astype(w0_ref.dtype)
    cov = jnp.dot(oh, wc_ref[...], preferred_element_type=jnp.float32)

    # ---- layer 0 of both branches, fused on the MXU (x @ [w0z | w0l]) -------
    # Linear + BatchNorm(eval, folded into w0/sh0) + ReLU (Dropout == identity)
    y0 = jnp.dot(x_ref[...], w0_ref[...], preferred_element_type=jnp.float32)
    y0 = jnp.maximum(y0 + cov[:, : 2 * nh] + sh0_ref[...], 0.0)
    h = y0[:, :nh]                   # z-branch hidden
    hl = y0[:, nh:]                  # l-branch hidden

    # ---- z branch, layer 1 ---------------------------------------------------
    h1 = jnp.dot(h.astype(w1_ref.dtype), w1_ref[...],
                 preferred_element_type=jnp.float32)
    q = jnp.maximum(h1 + cov[:, 2 * nh:] + sh1_ref[...], 0.0)

    # ---- all four heads fused into one block-diagonal matmul ----------------
    qh = jnp.concatenate([q, hl], axis=-1).astype(wh_ref.dtype)
    heads = jnp.dot(qh, wh_ref[...],
                    preferred_element_type=jnp.float32) + bh_ref[...]
    qz_m = heads[:, :nz]
    qz_v = jnp.exp(heads[:, nz:2 * nz]) + 1e-4
    ql_m = heads[:, 2 * nz:2 * nz + 1]
    ql_v = jnp.exp(heads[:, 2 * nz + 1:2 * nz + 2]) + 1e-4

    # ---- reparameterized samples ---------------------------------------------
    untran_z = qz_m + jnp.sqrt(qz_v) * eps_ref[:, :nz]        # Normal.rsample()
    mx = jnp.max(untran_z, axis=-1, keepdims=True)            # softmax ('ln')
    e = jnp.exp(untran_z - mx)
    z = e / jnp.sum(e, axis=-1, keepdims=True)                # exact reciprocal

    log_lib = jnp.minimum(
        ql_m + jnp.sqrt(ql_v) * eps_ref[:, nz:nz + 1], 15.0)  # clamp(max=15)
    lib = jnp.exp(log_lib)

    # ---- one unmasked lane-dense store of the full output slab ---------------
    packed = jnp.concatenate(
        [qz_m, qz_v, untran_z, z, ql_m, ql_v, log_lib, lib], axis=-1)
    pad = out_ref.shape[-1] - packed.shape[-1]
    if pad:
        packed = jnp.concatenate(
            [packed, jnp.zeros((tb, pad), jnp.float32)], axis=-1)
    out_ref[...] = packed


# --------------------------------------------------------------------------- #
# Parameter construction (BatchNorm folded into the matmul operands, packed
# for the fused kernel).  All folds are done in f32 and cast once to bf16.
# --------------------------------------------------------------------------- #
def init_params(key, n_input, n_output, n_hidden, n_cat):
    ks = iter(jax.random.split(key, 32))

    def lin(n_in, n_out):
        w = jax.random.normal(next(ks), (n_in, n_out), jnp.float32) * 0.05
        b = jax.random.normal(next(ks), (1, n_out), jnp.float32) * 0.01
        return w, b

    def bn(n):  # eval-mode BatchNorm1d(eps=1e-3) -> per-feature scale / shift
        gamma = 1.0 + 0.1 * jax.random.normal(next(ks), (n,), jnp.float32)
        beta = 0.1 * jax.random.normal(next(ks), (n,), jnp.float32)
        rm = 0.1 * jax.random.normal(next(ks), (n,), jnp.float32)
        rv = 0.5 + jax.random.uniform(next(ks), (n,), jnp.float32)
        scale = gamma / jnp.sqrt(rv + 1e-3)
        shift = beta - rm * scale
        return scale[None, :], shift[None, :]

    # z-encoder layer 0 / l-encoder layer 0 (both consume x), z-encoder layer 1
    w0f, b0 = lin(n_input + n_cat, n_hidden); s0, t0 = bn(n_hidden)
    wlf, bl = lin(n_input + n_cat, n_hidden); sl, tl = bn(n_hidden)
    w1f, b1 = lin(n_hidden + n_cat, n_hidden); s1, t1 = bn(n_hidden)
    # heads
    wzm, bzm = lin(n_hidden, n_output)
    wzv, bzv = lin(n_hidden, n_output)
    wlm, blm = lin(n_hidden, 1)
    wlv, blv = lin(n_hidden, 1)

    # fold BN scale into the weight columns; BN shift absorbs the linear bias
    w0x, w0c = w0f[:n_input] * s0, w0f[n_input:] * s0
    wlx, wlc = wlf[:n_input] * sl, wlf[n_input:] * sl
    w1x, w1c = w1f[:n_hidden] * s1, w1f[n_hidden:] * s1
    sh0 = jnp.concatenate([t0 + b0 * s0, tl + bl * sl], axis=1)   # (1, 2*nh)
    sh1 = t1 + b1 * s1                                            # (1, nh)

    # covariate table [layer0-z | layer0-l | layer1-z], rows padded for a clean
    # lane-128 one-hot matmul in-kernel (pad rows are zero -> no effect)
    ncat_pad = 128 * pl.cdiv(max(n_cat, 1), 128)
    wc = jnp.zeros((ncat_pad, 3 * n_hidden), jnp.float32)
    wc = wc.at[:n_cat].set(jnp.concatenate([w0c, wlc, w1c], axis=1))

    # block-diagonal fused head weights: [q | hl] @ [[wzm|wzv, 0], [0, wlm|wlv]]
    wh = jnp.zeros((2 * n_hidden, 2 * n_output + 2), jnp.float32)
    wh = wh.at[:n_hidden, :2 * n_output].set(jnp.concatenate([wzm, wzv], axis=1))
    wh = wh.at[n_hidden:, 2 * n_output:].set(jnp.concatenate([wlm, wlv], axis=1))
    bh = jnp.concatenate([bzm, bzv, blm, blv], axis=1)

    return {
        "w0": jnp.concatenate([w0x, wlx], axis=1).astype(jnp.bfloat16),
        "sh0": sh0,
        "wc": wc.astype(jnp.bfloat16),
        "w1": w1x.astype(jnp.bfloat16),
        "sh1": sh1,
        "wh": wh.astype(jnp.bfloat16),
        "bh": bh,
    }


# --------------------------------------------------------------------------- #
# Wrapper
# --------------------------------------------------------------------------- #
def encoder_totalvi_forward(data, cat_idx, eps_z, eps_l, params):
    B, n_input = data.shape
    nz = eps_z.shape[1]
    nh = params["w1"].shape[0]
    out_w = 128 * pl.cdiv(4 * nz + 4, 128)            # lane-dense slab width

    x = data.astype(jnp.bfloat16)                     # bf16 MXU operand
    cat2d = cat_idx.reshape(B, 1).astype(jnp.int32)   # per-row covariate index
    eps = jnp.concatenate([eps_z, eps_l], axis=1)     # one noise slab (B, nz+1)

    # Batch tile: multiple of 8, >= 2 grid steps when B allows it (v7x megacore
    # + DMA/compute pipelining), capped by input width so double-buffered x
    # tiles fit the v5e 16 MiB scoped default / v7x 64 MiB physical VMEM.
    cap = 512 if n_input < 4096 else 256
    TB = min(cap, max(8, _round_up(pl.cdiv(B, 2), 8)))
    if TB >= B:
        TB = B
    grid = (pl.cdiv(B, TB),)

    def rows(width):   # batch-tiled arrays
        return pl.BlockSpec((TB, width), lambda i: (i, 0))

    def whole(a):      # grid-invariant parameters (same block every step)
        return pl.BlockSpec(a.shape, lambda i: (0, 0))

    ordered = [
        x, cat2d, eps,
        params["w0"], params["sh0"], params["wc"],
        params["w1"], params["sh1"], params["wh"], params["bh"],
    ]
    in_specs = ([rows(n_input), rows(1), rows(nz + 1)]
                + [whole(a) for a in ordered[3:]])

    out = pl.pallas_call(
        encoder_totalvi_kernel,
        out_shape=jax.ShapeDtypeStruct((B, out_w), jnp.float32),
        grid_spec=pltpu.PrefetchScalarGridSpec(
            num_scalar_prefetch=0,
            grid=grid,
            in_specs=in_specs,
            out_specs=rows(out_w),
        ),
        compiler_params=pltpu.CompilerParams(
            dimension_semantics=("parallel",),
            vmem_limit_bytes=64 * 1024 * 1024,   # explicit: above the 16/32 MiB
        ),                                       # scoped defaults, <= physical
    )(*ordered)

    qz_m     = out[:, 0 * nz:1 * nz]
    qz_v     = out[:, 1 * nz:2 * nz]
    untran_z = out[:, 2 * nz:3 * nz]
    z        = out[:, 3 * nz:4 * nz]
    ql_m     = out[:, 4 * nz + 0:4 * nz + 1]
    ql_v     = out[:, 4 * nz + 1:4 * nz + 2]
    log_lib  = out[:, 4 * nz + 2:4 * nz + 3]
    lib      = out[:, 4 * nz + 3:4 * nz + 4]
    return qz_m, qz_v, z, untran_z, ql_m, ql_v, lib, log_lib


# --------------------------------------------------------------------------- #
# Pure-JAX reference (same packed parameters, same eval-mode math)
# --------------------------------------------------------------------------- #
def reference_forward(data, cat_idx, eps_z, eps_l, params):
    f32, hi = jnp.float32, jax.lax.Precision.HIGHEST
    nh = params["w1"].shape[0]
    nz = eps_z.shape[1]
    x = data.astype(jnp.bfloat16).astype(f32)
    oh = jax.nn.one_hot(cat_idx, params["wc"].shape[0], dtype=f32)
    cov = jnp.dot(oh, params["wc"].astype(f32), precision=hi)
    y0 = jnp.maximum(jnp.dot(x, params["w0"].astype(f32), precision=hi)
                     + cov[:, :2 * nh] + params["sh0"], 0.0)
    h, hl = y0[:, :nh], y0[:, nh:]
    q = jnp.maximum(jnp.dot(h.astype(jnp.bfloat16).astype(f32),
                            params["w1"].astype(f32), precision=hi)
                    + cov[:, 2 * nh:] + params["sh1"], 0.0)
    qh = jnp.concatenate([q, hl], axis=-1).astype(jnp.bfloat16).astype(f32)
    heads = jnp.dot(qh, params["wh"].astype(f32), precision=hi) + params["bh"]
    qz_m = heads[:, :nz]
    qz_v = jnp.exp(heads[:, nz:2 * nz]) + 1e-4
    ql_m = heads[:, 2 * nz:2 * nz + 1]
    ql_v = jnp.exp(heads[:, 2 * nz + 1:2 * nz + 2]) + 1e-4
    untran_z = qz_m + jnp.sqrt(qz_v) * eps_z
    z = jax.nn.softmax(untran_z, axis=-1)
    log_lib = jnp.minimum(ql_m + jnp.sqrt(ql_v) * eps_l, 15.0)
    lib = jnp.exp(log_lib)
    return qz_m, qz_v, z, untran_z, ql_m, ql_v, lib, log_lib


if __name__ == "__main__":
    key = jax.random.PRNGKey(0)
    B, n_input, n_hidden, n_output, n_cat = 8, 32, 128, 16, 3

    k_data, k_cat, k_ez, k_el, k_params = jax.random.split(key, 5)
    data = jax.random.normal(k_data, (B, n_input), jnp.float32)
    cat_idx = jax.random.randint(k_cat, (B,), 0, n_cat)
    eps_z = jax.random.normal(k_ez, (B, n_output), jnp.float32)   # rsample noise
    eps_l = jax.random.normal(k_el, (B, 1), jnp.float32)          # rsample noise

    params = init_params(k_params, n_input, n_output, n_hidden, n_cat)

    fwd = jax.jit(encoder_totalvi_forward)
    outs = jax.block_until_ready(fwd(data, cat_idx, eps_z, eps_l, params))
    qz_m, qz_v, z, untran_z, ql_m, ql_v, library, log_library = outs

    # sanity: softmax rows sum to 1 (exact reciprocal), variances > 0,
    #         library == exp(log_library)
    assert bool(jnp.allclose(jnp.sum(z, axis=-1), 1.0, atol=1e-4))
    assert bool(jnp.all(qz_v > 0)) and bool(jnp.all(ql_v > 0))
    assert bool(jnp.allclose(library, jnp.exp(log_library), rtol=1e-4, atol=1e-5))

    # parity against the pure-JAX reference using the same packed parameters
    ref = reference_forward(data, cat_idx, eps_z, eps_l, params)
    names = ["qz_m", "qz_v", "z", "untran_z", "ql_m", "ql_v", "lib", "log_lib"]
    for got, want, name in zip(outs, ref, names):
        assert bool(jnp.allclose(got, want, rtol=5e-3, atol=5e-3)), name

    print("KERNEL_OK")
</pallas_src>

<mosaic_0001>
module attributes {stable_mosaic.version = 11 : i64} {
  func.func @encoder_totalvi_kernel(%arg0: i32, %arg1: memref<8x32xbf16, #tpu.memory_space<vmem>>, %arg2: memref<8x1xi32, #tpu.memory_space<vmem>>, %arg3: memref<8x17xf32, #tpu.memory_space<vmem>>, %arg4: memref<32x256xbf16, #tpu.memory_space<vmem>>, %arg5: memref<1x256xf32, #tpu.memory_space<vmem>>, %arg6: memref<128x384xbf16, #tpu.memory_space<vmem>>, %arg7: memref<128x128xbf16, #tpu.memory_space<vmem>>, %arg8: memref<1x128xf32, #tpu.memory_space<vmem>>, %arg9: memref<256x34xbf16, #tpu.memory_space<vmem>>, %arg10: memref<1x34xf32, #tpu.memory_space<vmem>>, %arg11: memref<8x128xf32, #tpu.memory_space<vmem>>) attributes {dimension_semantics = [#tpu.dimension_semantics<parallel>], iteration_bounds = array<i64: 1>, scalar_prefetch = 0 : i64, scratch_operands = 0 : i64, tpu.core_type = #tpu.core_type<tc>, window_params = [{transform_indices = @transform_0, window_bounds = array<i64: 8, 32>}, {transform_indices = @transform_1, window_bounds = array<i64: 8, 1>}, {transform_indices = @transform_2, window_bounds = array<i64: 8, 17>}, {pipeline_mode = #tpu.pipeline_mode<synchronous>, transform_indices = @transform_3, window_bounds = array<i64: 32, 256>}, {pipeline_mode = #tpu.pipeline_mode<synchronous>, transform_indices = @transform_4, window_bounds = array<i64: 1, 256>}, {pipeline_mode = #tpu.pipeline_mode<synchronous>, transform_indices = @transform_5, window_bounds = array<i64: 128, 384>}, {pipeline_mode = #tpu.pipeline_mode<synchronous>, transform_indices = @transform_6, window_bounds = array<i64: 128, 128>}, {pipeline_mode = #tpu.pipeline_mode<synchronous>, transform_indices = @transform_7, window_bounds = array<i64: 1, 128>}, {pipeline_mode = #tpu.pipeline_mode<synchronous>, transform_indices = @transform_8, window_bounds = array<i64: 256, 34>}, {pipeline_mode = #tpu.pipeline_mode<synchronous>, transform_indices = @transform_9, window_bounds = array<i64: 1, 34>}, {transform_indices = @transform_10, window_bounds = array<i64: 8, 128>}]} {
    %0 = tpu.iota {dimensions = array<i32: 1>} : vector<8x128xi32>
    %c0 = arith.constant 0 : index
    %c0_0 = arith.constant 0 : index
    %1 = vector.load %arg2[%c0, %c0_0] : memref<8x1xi32, #tpu.memory_space<vmem>>, vector<8x1xi32>
    %2 = vector.broadcast %1 : vector<8x1xi32> to vector<8x128xi32>
    %3 = arith.cmpi eq, %0, %2 : vector<8x128xi32>
    %4 = arith.extui %3 : vector<8x128xi1> to vector<8x128xi32>
    %5 = arith.sitofp %4 : vector<8x128xi32> to vector<8x128xf32>
    %6 = arith.truncf %5 : vector<8x128xf32> to vector<8x128xbf16>
    %c0_1 = arith.constant 0 : index
    %c0_2 = arith.constant 0 : index
    %7 = vector.load %arg6[%c0_1, %c0_2] : memref<128x384xbf16, #tpu.memory_space<vmem>>, vector<128x384xbf16>
    %cst = arith.constant dense<0.000000e+00> : vector<8x384xf32>
    %8 = tpu.matmul %6, %7, %cst {dimension_numbers = #tpu.dot_dimension_numbers<[1], [0], [0], [1], [0, 0, 1, 1], [], []>} : vector<8x128xbf16>, vector<128x384xbf16>, vector<8x384xf32> -> vector<8x384xf32>
    %c0_3 = arith.constant 0 : index
    %c0_4 = arith.constant 0 : index
    %9 = vector.load %arg1[%c0_3, %c0_4] : memref<8x32xbf16, #tpu.memory_space<vmem>>, vector<8x32xbf16>
    %c0_5 = arith.constant 0 : index
    %c0_6 = arith.constant 0 : index
    %10 = vector.load %arg4[%c0_5, %c0_6] : memref<32x256xbf16, #tpu.memory_space<vmem>>, vector<32x256xbf16>
    %cst_7 = arith.constant dense<0.000000e+00> : vector<8x256xf32>
    %11 = tpu.matmul %9, %10, %cst_7 {dimension_numbers = #tpu.dot_dimension_numbers<[1], [0], [0], [1], [0, 0, 1, 1], [], []>} : vector<8x32xbf16>, vector<32x256xbf16>, vector<8x256xf32> -> vector<8x256xf32>
    %12 = vector.extract_strided_slice %8 {offsets = [0, 0], sizes = [8, 256], strides = [1, 1]} : vector<8x384xf32> to vector<8x256xf32>
    %13 = arith.addf %11, %12 : vector<8x256xf32>
    %c0_8 = arith.constant 0 : index
    %c0_9 = arith.constant 0 : index
    %14 = vector.load %arg5[%c0_8, %c0_9] : memref<1x256xf32, #tpu.memory_space<vmem>>, vector<1x256xf32>
    %15 = vector.broadcast %14 : vector<1x256xf32> to vector<8x256xf32>
    %16 = arith.addf %13, %15 : vector<8x256xf32>
    %cst_10 = arith.constant 0.000000e+00 : f32
    %17 = vector.broadcast %cst_10 : f32 to vector<8x256xf32>
    %18 = arith.maximumf %16, %17 : vector<8x256xf32>
    %19 = vector.extract_strided_slice %18 {offsets = [0, 0], sizes = [8, 128], strides = [1, 1]} : vector<8x256xf32> to vector<8x128xf32>
    %20 = vector.extract_strided_slice %18 {offsets = [0, 128], sizes = [8, 128], strides = [1, 1]} : vector<8x256xf32> to vector<8x128xf32>
    %21 = arith.truncf %19 : vector<8x128xf32> to vector<8x128xbf16>
    %c0_11 = arith.constant 0 : index
    %c0_12 = arith.constant 0 : index
    %22 = vector.load %arg7[%c0_11, %c0_12] : memref<128x128xbf16, #tpu.memory_space<vmem>>, vector<128x128xbf16>
    %cst_13 = arith.constant dense<0.000000e+00> : vector<8x128xf32>
    %23 = tpu.matmul %21, %22, %cst_13 {dimension_numbers = #tpu.dot_dimension_numbers<[1], [0], [0], [1], [0, 0, 1, 1], [], []>} : vector<8x128xbf16>, vector<128x128xbf16>, vector<8x128xf32> -> vector<8x128xf32>
    %24 = vector.extract_strided_slice %8 {offsets = [0, 256], sizes = [8, 128], strides = [1, 1]} : vector<8x384xf32> to vector<8x128xf32>
    %25 = arith.addf %23, %24 : vector<8x128xf32>
    %c0_14 = arith.constant 0 : index
    %c0_15 = arith.constant 0 : index
    %26 = vector.load %arg8[%c0_14, %c0_15] : memref<1x128xf32, #tpu.memory_space<vmem>>, vector<1x128xf32>
    %27 = vector.broadcast %26 : vector<1x128xf32> to vector<8x128xf32>
    %28 = arith.addf %25, %27 : vector<8x128xf32>
    %cst_16 = arith.constant 0.000000e+00 : f32
    %29 = vector.broadcast %cst_16 : f32 to vector<8x128xf32>
    %30 = arith.maximumf %28, %29 : vector<8x128xf32>
    %31 = tpu.concatenate %30, %20 in 1 : vector<8x128xf32>, vector<8x128xf32> -> vector<8x256xf32>
    %32 = arith.truncf %31 : vector<8x256xf32> to vector<8x256xbf16>
    %c0_17 = arith.constant 0 : index
    %c0_18 = arith.constant 0 : index
    %33 = vector.load %arg9[%c0_17, %c0_18] : memref<256x34xbf16, #tpu.memory_space<vmem>>, vector<256x34xbf16>
    %cst_19 = arith.constant dense<0.000000e+00> : vector<8x34xf32>
    %34 = tpu.matmul %32, %33, %cst_19 {dimension_numbers = #tpu.dot_dimension_numbers<[1], [0], [0], [1], [0, 0, 1, 1], [], []>} : vector<8x256xbf16>, vector<256x34xbf16>, vector<8x34xf32> -> vector<8x34xf32>
    %c0_20 = arith.constant 0 : index
    %c0_21 = arith.constant 0 : index
    %35 = vector.load %arg10[%c0_20, %c0_21] : memref<1x34xf32, #tpu.memory_space<vmem>>, vector<1x34xf32>
    %36 = vector.broadcast %35 : vector<1x34xf32> to vector<8x34xf32>
    %37 = arith.addf %34, %36 : vector<8x34xf32>
    %38 = vector.extract_strided_slice %37 {offsets = [0, 0], sizes = [8, 16], strides = [1, 1]} : vector<8x34xf32> to vector<8x16xf32>
    %39 = vector.extract_strided_slice %37 {offsets = [0, 16], sizes = [8, 16], strides = [1, 1]} : vector<8x34xf32> to vector<8x16xf32>
    %40 = math.exp %39 : vector<8x16xf32>
    %cst_22 = arith.constant 9.99999974E-5 : f32
    %41 = vector.broadcast %cst_22 : f32 to vector<8x16xf32>
    %42 = arith.addf %40, %41 : vector<8x16xf32>
    %43 = vector.extract_strided_slice %37 {offsets = [0, 32], sizes = [8, 1], strides = [1, 1]} : vector<8x34xf32> to vector<8x1xf32>
    %44 = vector.extract_strided_slice %37 {offsets = [0, 33], sizes = [8, 1], strides = [1, 1]} : vector<8x34xf32> to vector<8x1xf32>
    %45 = math.exp %44 : vector<8x1xf32>
    %cst_23 = arith.constant 9.99999974E-5 : f32
    %46 = vector.broadcast %cst_23 : f32 to vector<8x1xf32>
    %47 = arith.addf %45, %46 : vector<8x1xf32>
    %48 = math.sqrt %42 : vector<8x16xf32>
    %c0_24 = arith.constant 0 : index
    %c0_25 = arith.constant 0 : index
    %49 = vector.load %arg3[%c0_24, %c0_25] : memref<8x17xf32, #tpu.memory_space<vmem>>, vector<8x16xf32>
    %50 = arith.mulf %48, %49 : vector<8x16xf32>
    %51 = arith.addf %38, %50 : vector<8x16xf32>
    %cst_26 = arith.constant dense<0xFF800000> : vector<8xf32>
    %52 = vector.multi_reduction <maximumf>, %51, %cst_26 [1] : vector<8x16xf32> to vector<8xf32>
    %53 = vector.shape_cast %52 : vector<8xf32> to vector<8x1xf32>
    %54 = vector.broadcast %53 : vector<8x1xf32> to vector<8x16xf32>
    %55 = arith.subf %51, %54 : vector<8x16xf32>
    %56 = math.exp %55 : vector<8x16xf32>
    %cst_27 = arith.constant dense<0.000000e+00> : vector<8xf32>
    %57 = vector.multi_reduction <add>, %56, %cst_27 [1] : vector<8x16xf32> to vector<8xf32>
    %58 = vector.shape_cast %57 : vector<8xf32> to vector<8x1xf32>
    %59 = vector.broadcast %58 : vector<8x1xf32> to vector<8x16xf32>
    %60 = arith.divf %56, %59 : vector<8x16xf32>
    %61 = math.sqrt %47 : vector<8x1xf32>
    %c0_28 = arith.constant 0 : index
    %c16 = arith.constant 16 : index
    %62 = vector.load %arg3[%c0_28, %c16] : memref<8x17xf32, #tpu.memory_space<vmem>>, vector<8x1xf32>
    %63 = arith.mulf %61, %62 : vector<8x1xf32>
    %64 = arith.addf %43, %63 : vector<8x1xf32>
    %cst_29 = arith.constant 1.500000e+01 : f32
    %65 = vector.broadcast %cst_29 : f32 to vector<8x1xf32>
    %66 = arith.minimumf %64, %65 : vector<8x1xf32>
    %67 = math.exp %66 : vector<8x1xf32>
    %68 = tpu.concatenate %38, %42, %51, %60, %43, %47, %66, %67 in 1 : vector<8x16xf32>, vector<8x16xf32>, vector<8x16xf32>, vector<8x16xf32>, vector<8x1xf32>, vector<8x1xf32>, vector<8x1xf32>, vector<8x1xf32> -> vector<8x68xf32>
    %cst_30 = arith.constant 0.000000e+00 : f32
    %69 = vector.broadcast %cst_30 : f32 to vector<8x60xf32>
    %70 = tpu.concatenate %68, %69 in 1 : vector<8x68xf32>, vector<8x60xf32> -> vector<8x128xf32>
    %c0_31 = arith.constant 0 : index
    %c0_32 = arith.constant 0 : index
    %71 = vector.load %arg11[%c0_31, %c0_32] : memref<8x128xf32, #tpu.memory_space<vmem>>, vector<8x128xf32>
    tpu.vector_store %arg11[%c0_31, %c0_32], %70 {strides = array<i32>} : memref<8x128xf32, #tpu.memory_space<vmem>>, vector<8x128xf32>,
    return
  }
  func.func @transform_0(%arg0: i32) -> (i32, i32) {
    %c0_i32 = arith.constant 0 : i32
    %c0_i32_0 = arith.constant 0 : i32
    return %arg0, %c0_i32 : i32, i32
  }
  func.func @transform_1(%arg0: i32) -> (i32, i32) {
    %c0_i32 = arith.constant 0 : i32
    %c0_i32_0 = arith.constant 0 : i32
    return %arg0, %c0_i32 : i32, i32
  }
  func.func @transform_2(%arg0: i32) -> (i32, i32) {
    %c0_i32 = arith.constant 0 : i32
    %c0_i32_0 = arith.constant 0 : i32
    return %arg0, %c0_i32 : i32, i32
  }
  func.func @transform_3(%arg0: i32) -> (i32, i32) {
    %c0_i32 = arith.constant 0 : i32
    %c0_i32_0 = arith.constant 0 : i32
    %c0_i32_1 = arith.constant 0 : i32
    return %c0_i32, %c0_i32_0 : i32, i32
  }
  func.func @transform_4(%arg0: i32) -> (i32, i32) {
    %c0_i32 = arith.constant 0 : i32
    %c0_i32_0 = arith.constant 0 : i32
    %c0_i32_1 = arith.constant 0 : i32
    return %c0_i32, %c0_i32_0 : i32, i32
  }
  func.func @transform_5(%arg0: i32) -> (i32, i32) {
    %c0_i32 = arith.constant 0 : i32
    %c0_i32_0 = arith.constant 0 : i32
    %c0_i32_1 = arith.constant 0 : i32
    return %c0_i32, %c0_i32_0 : i32, i32
  }
  func.func @transform_6(%arg0: i32) -> (i32, i32) {
    %c0_i32 = arith.constant 0 : i32
    %c0_i32_0 = arith.constant 0 : i32
    %c0_i32_1 = arith.constant 0 : i32
    return %c0_i32, %c0_i32_0 : i32, i32
  }
  func.func @transform_7(%arg0: i32) -> (i32, i32) {
    %c0_i32 = arith.constant 0 : i32
    %c0_i32_0 = arith.constant 0 : i32
    %c0_i32_1 = arith.constant 0 : i32
    return %c0_i32, %c0_i32_0 : i32, i32
  }
  func.func @transform_8(%arg0: i32) -> (i32, i32) {
    %c0_i32 = arith.constant 0 : i32
    %c0_i32_0 = arith.constant 0 : i32
    %c0_i32_1 = arith.constant 0 : i32
    return %c0_i32, %c0_i32_0 : i32, i32
  }
  func.func @transform_9(%arg0: i32) -> (i32, i32) {
    %c0_i32 = arith.constant 0 : i32
    %c0_i32_0 = arith.constant 0 : i32
    %c0_i32_1 = arith.constant 0 : i32
    return %c0_i32, %c0_i32_0 : i32, i32
  }
  func.func @transform_10(%arg0: i32) -> (i32, i32) {
    %c0_i32 = arith.constant 0 : i32
    %c0_i32_0 = arith.constant 0 : i32
    return %arg0, %c0_i32 : i32, i32
  }
}

</mosaic_0001>

<bundles_post_ra>
// kernel: encoder_totalvi_forward.1
= control target key start
LH: loop header
LB: loop body
LE: loop exit
PB: predicated region body
PF: predicated region fallthrough
CT: control target
= control target key end

     0   :  { %15 = vsyncpa [#allocation3], 0  ;;  %s1644_s0 = inlined_call_operand.hbm [shape: bf16[8,32], index: 0, kind: input, shape index: {}]   ;;  %s1645_s1 = inlined_call_operand.hbm [shape: s32[8,1], index: 1, kind: input, shape index: {}]   ;;  %s1646_s2 = inlined_call_operand.hbm [shape: f32[8,17], index: 2, kind: input, shape index: {}]   ;;  %s1647_s3 = inlined_call_operand.hbm [shape: bf16[32,256], index: 3, kind: input, shape index: {}]   ;;  %s1648_s4 = inlined_call_operand.hbm [shape: f32[1,256], index: 4, kind: input, shape index: {}]   ;;  %s1649_s5 = inlined_call_operand.hbm [shape: bf16[128,384], index: 5, kind: input, shape index: {}]   ;;  %s1650_s6 = inlined_call_operand.hbm [shape: bf16[128,128], index: 6, kind: input, shape index: {}]   ;;  %s1651_s7 = inlined_call_operand.hbm [shape: f32[1,128], index: 7, kind: input, shape index: {}]   ;;  %s1652_s8 = inlined_call_operand.hbm [shape: bf16[256,34], index: 8, kind: input, shape index: {}]   ;;  %s1653_s9 = inlined_call_operand.hbm [shape: f32[1,34], index: 9, kind: input, shape index: {}]   ;;  %s1654_s10 = inlined_call_operand.hbm [shape: f32[8,128], index: 10, kind: output, shape index: {}]  }
   0x1   :  { %16 = vsyncpa [#allocation6], 0 }
   0x2   :  { %17 = vsyncpa [#allocation9], 0 }
   0x3   :  { %18 = vsyncpa [#allocation12], 0 }
   0x4   :  { %19 = vsyncpa [#allocation15], 0 }
   0x5   :  { %20 = vsyncpa [#allocation18], 0 }
   0x6   :  { %21 = vsyncpa [#allocation4], 0  ;;  %s1391_s13 = smov [#allocation5]   ;;  %s1392_s15 = smov [#allocation8]  }
   0x7   :  { %s38_s14 = sshll.u32 %s1391_s13, 4  ;;  %s57_s16 = sshll.u32 %s1392_s15, 4  ;;  %s39_s14 = int_to_ptr.vmem [resolvable:$true] %s38_s14  ;;  %s1475_s16 = int_to_ptr.vmem [resolvable:$true] %s57_s16 }
   0x8   :  { %s1135_s19 = scalar_lea.hbm %s1645_s1, 128 }
   0x9   :  { %p1136_p0 = scmp.ne.s32.totalorder %s1645_s1, %s1135_s19  ;;  %p1139_p1 = scmp.lt.u32.totalorder %s1135_s19, %s1645_s1 }
   0xb   :  { %p1141_p2 = pnand %p1139_p1, %p1136_p0 }
   0xd   :  { %1144 = shalt.err (!%p1141_p2)
}
   0xe   :  { %s1145_s24 = scalar_lea.vmem %s39_s14, 128  ;;  %p1150_p4 = scmp.lt.s32.totalorder %s39_s14, %s39_s14 }
   0xf   :  { %p1146_p3 = scmp.ne.s32.totalorder %s39_s14, %s1145_s24  ;;  %p1151_p5 = scmp.lt.s32.totalorder %s1145_s24, %s1145_s24 }
  0x11   :  { %p1152_p6 = por %p1151_p5, %p1150_p4 }
  0x13   :  { %p1153_p7 = pnand %p1152_p6, %p1146_p3 }
  0x15   :  { %1156 = shalt.err (!%p1153_p7)
}
  0x16   :  { %41 = dma.hbm_to_vmem [thread:$0]  %s1645_s1, 128, %s39_s14, [#allocation6]  }
  0x17   :  { %s1157_s29 = scalar_lea.hbm %s1647_s3, 512 }
  0x18   :  { %p1158_p8 = scmp.ne.s32.totalorder %s1647_s3, %s1157_s29  ;;  %p1161_p9 = scmp.lt.u32.totalorder %s1157_s29, %s1647_s3 }
  0x1a   :  { %p1163_p10 = pnand %p1161_p9, %p1158_p8 }
  0x1c   :  { %1166 = shalt.err (!%p1163_p10)
}
  0x1d   :  { %s1167_s15 = scalar_lea.vmem %s1475_s16, 512  ;;  %p1172_p12 = scmp.lt.s32.totalorder %s1475_s16, %s1475_s16 }
  0x1e   :  { %p1168_p11 = scmp.ne.s32.totalorder %s1475_s16, %s1167_s15  ;;  %p1173_p13 = scmp.lt.s32.totalorder %s1167_s15, %s1167_s15 }
  0x20   :  { %p1174_p0 = por %p1173_p13, %p1172_p12 }
  0x22   :  { %p1175_p1 = pnand %p1174_p0, %p1168_p11 }
  0x24   :  { %1178 = shalt.err (!%p1175_p1)
}
  0x25   :  { %s1393_s1 = smov 128   ;;  %s1394_s14 = smov 8  }
  0x26   :  { %63 = dma.hbm_to_vmem [thread:$0]  %s1647_s3, 512, %s1475_s16, [#allocation9], %s1393_s1, %s1393_s1, %s1394_s14  }
  0x27   :  { %s1395_s19 = smov [#allocation11]   ;;  %s1179_s23 = scalar_lea.hbm %s1649_s5, 3072 }
  0x28   :  { %s79_s20 = sshll.u32 %s1395_s19, 4  ;;  %p1180_p2 = scmp.ne.s32.totalorder %s1649_s5, %s1179_s23  ;;  %s80_s20 = int_to_ptr.vmem [resolvable:$true] %s79_s20 }
  0x29   :  { %p1183_p3 = scmp.lt.u32.totalorder %s1179_s23, %s1649_s5 }
  0x2b   :  { %p1185_p4 = pnand %p1183_p3, %p1180_p2 }
  0x2d   :  { %1188 = shalt.err (!%p1185_p4)
}
  0x2e   :  { %s1189_s28 = scalar_lea.vmem %s80_s20, 3072  ;;  %p1194_p6 = scmp.lt.s32.totalorder %s80_s20, %s80_s20 }
  0x2f   :  { %p1190_p5 = scmp.ne.s32.totalorder %s80_s20, %s1189_s28  ;;  %p1195_p7 = scmp.lt.s32.totalorder %s1189_s28, %s1189_s28 }
  0x31   :  { %p1196_p8 = por %p1195_p7, %p1194_p6 }
  0x33   :  { %p1197_p9 = pnand %p1196_p8, %p1190_p5 }
  0x35   :  { %1200 = shalt.err (!%p1197_p9)
}
  0x36   :  { %s1396_s3 = smov 192   ;;  %s1397_s16 = smov 12  }
  0x37   :  { %85 = dma.hbm_to_vmem [thread:$0]  %s1649_s5, 3072, %s80_s20, [#allocation12], %s1396_s3, %s1396_s3, %s1397_s16  }
  0x38   :  { %s1398_s11 = smov [#allocation14]   ;;  %s1399_s13 = smov [#allocation2]  }
  0x39   :  { %s104_s12 = sshll.u32 %s1398_s11, 4  ;;  %s28_s15 = sshll.u32 %s1399_s13, 4  ;;  %s105_s12 = int_to_ptr.vmem [resolvable:$true] %s104_s12  ;;  %s29_s15 = int_to_ptr.vmem [resolvable:$true] %s28_s15 }
  0x3a   :  { %s1201_s17 = scalar_lea.hbm %s1651_s7, 16 }
  0x3b   :  { %p1202_p10 = scmp.ne.s32.totalorder %s1651_s7, %s1201_s17  ;;  %p1205_p11 = scmp.lt.u32.totalorder %s1201_s17, %s1651_s7 }
  0x3d   :  { %p1207_p12 = pnand %p1205_p11, %p1202_p10 }
  0x3f   :  { %1210 = shalt.err (!%p1207_p12)
}
  0x40   :  { %s1211_s5 = scalar_lea.vmem %s105_s12, 16  ;;  %s1215_s20 = scalar_lea.vmem %s105_s12, 32 }
  0x41   :  { %p1212_p13 = scmp.ne.s32.totalorder %s105_s12, %s1211_s5  ;;  %p1216_p0 = scmp.lt.s32.totalorder %s105_s12, %s105_s12 }
  0x42   :  { %p1217_p1 = scmp.lt.s32.totalorder %s1215_s20, %s1211_s5 }
  0x44   :  { %p1218_p2 = por %p1217_p1, %p1216_p0 }
  0x46   :  { %p1219_p3 = pnand %p1218_p2, %p1212_p13 }
  0x48   :  { %1222 = shalt.err (!%p1219_p3)
}
  0x49   :  { %107 = dma.hbm_to_vmem [thread:$0]  %s1651_s7, 16, %s105_s12, [#allocation15]  }
  0x4a   :  { %s1223_s27 = scalar_lea.hbm %s1644_s0, 64 }
  0x4b   :  { %p1224_p4 = scmp.ne.s32.totalorder %s1644_s0, %s1223_s27  ;;  %p1227_p5 = scmp.lt.u32.totalorder %s1223_s27, %s1644_s0 }
  0x4d   :  { %p1229_p6 = pnand %p1227_p5, %p1224_p4 }
  0x4f   :  { %1232 = shalt.err (!%p1229_p6)
}
  0x50   :  { %s1233_s30 = scalar_lea.vmem %s29_s15, 64  ;;  %p1238_p8 = scmp.lt.s32.totalorder %s29_s15, %s29_s15 }
  0x51   :  { %p1234_p7 = scmp.ne.s32.totalorder %s29_s15, %s1233_s30  ;;  %p1239_p9 = scmp.lt.s32.totalorder %s1233_s30, %s1233_s30 }
  0x53   :  { %p1240_p10 = por %p1239_p9, %p1238_p8 }
  0x55   :  { %p1241_p11 = pnand %p1240_p10, %p1234_p7 }
  0x57   :  { %1244 = shalt.err (!%p1241_p11)
}
  0x58   :  { %31 = dma.hbm_to_vmem [thread:$0]  %s1644_s0, 64, %s29_s15, [#allocation3]  }
  0x59   :  { %s1400_s12 = smov [#allocation7]   ;;  %s1401_s1 = smov [#allocation10]  }
  0x5a   :  { %s48_s13 = sshll.u32 %s1400_s12, 4  ;;  %s70_s14 = sshll.u32 %s1401_s1, 4  ;;  %s49_s13 = int_to_ptr.vmem [resolvable:$true] %s48_s13  ;;  %s71_s14 = int_to_ptr.vmem [resolvable:$true] %s70_s14 }
  0x5b   :  { %s1245_s19 = scalar_lea.hbm %s1646_s2, 128 }
  0x5c   :  { %p1246_p12 = scmp.ne.s32.totalorder %s1646_s2, %s1245_s19  ;;  %p1249_p13 = scmp.lt.u32.totalorder %s1245_s19, %s1646_s2 }
  0x5e   :  { %p1251_p0 = pnand %p1249_p13, %p1246_p12 }
  0x60   :  { %1254 = shalt.err (!%p1251_p0)
}
  0x61   :  { %s1255_s0 = scalar_lea.vmem %s49_s13, 128  ;;  %p1260_p2 = scmp.lt.s32.totalorder %s49_s13, %s49_s13 }
  0x62   :  { %p1256_p1 = scmp.ne.s32.totalorder %s49_s13, %s1255_s0  ;;  %p1261_p3 = scmp.lt.s32.totalorder %s1255_s0, %s1255_s0 }
  0x64   :  { %p1262_p4 = por %p1261_p3, %p1260_p2 }
  0x66   :  { %p1263_p5 = pnand %p1262_p4, %p1256_p1 }
  0x68   :  { %1266 = shalt.err (!%p1263_p5)
}
  0x69   :  { %51 = dma.hbm_to_vmem [thread:$0]  %s1646_s2, 128, %s49_s13, [#allocation6]  }
  0x6a   :  { %s1267_s26 = scalar_lea.hbm %s1648_s4, 32 }
  0x6b   :  { %p1268_p6 = scmp.ne.s32.totalorder %s1648_s4, %s1267_s26  ;;  %p1271_p7 = scmp.lt.u32.totalorder %s1267_s26, %s1648_s4 }
  0x6d   :  { %p1273_p8 = pnand %p1271_p7, %p1268_p6 }
  0x6f   :  { %1276 = shalt.err (!%p1273_p8)
}
  0x70   :  { %s1277_s29 = scalar_lea.vmem %s71_s14, 32  ;;  %p1282_p10 = scmp.lt.s32.totalorder %s71_s14, %s71_s14 }
  0x71   :  { %p1278_p9 = scmp.ne.s32.totalorder %s71_s14, %s1277_s29  ;;  %p1283_p11 = scmp.lt.s32.totalorder %s1277_s29, %s1277_s29 }
  0x73   :  { %p1284_p12 = por %p1283_p11, %p1282_p10 }
  0x75   :  { %p1285_p13 = pnand %p1284_p12, %p1278_p9 }
  0x77   :  { %1288 = shalt.err (!%p1285_p13)
}
  0x78   :  { %73 = dma.hbm_to_vmem [thread:$0]  %s1648_s4, 32, %s71_s14, [#allocation9]  }
  0x79   :  { %s1402_s7 = smov [#allocation13]   ;;  %s1289_s1 = scalar_lea.hbm %s1650_s6, 1024 }
  0x7a   :  { %s91_s11 = sshll.u32 %s1402_s7, 4  ;;  %p1290_p0 = scmp.ne.s32.totalorder %s1650_s6, %s1289_s1  ;;  %s92_s11 = int_to_ptr.vmem [resolvable:$true] %s91_s11 }
  0x7b   :  { %p1293_p1 = scmp.lt.u32.totalorder %s1289_s1, %s1650_s6 }
  0x7d   :  { %p1295_p2 = pnand %p1293_p1, %p1290_p0 }
  0x7f   :  { %1298 = shalt.err (!%p1295_p2)
}
  0x80   :  { %s1299_s22 = scalar_lea.vmem %s92_s11, 1024  ;;  %p1304_p4 = scmp.lt.s32.totalorder %s92_s11, %s92_s11 }
  0x81   :  { %p1300_p3 = scmp.ne.s32.totalorder %s92_s11, %s1299_s22  ;;  %p1305_p5 = scmp.lt.s32.totalorder %s1299_s22, %s1299_s22 }
  0x83   :  { %p1306_p6 = por %p1305_p5, %p1304_p4 }
  0x85   :  { %p1307_p7 = pnand %p1306_p6, %p1300_p3 }
  0x87   :  { %1310 = shalt.err (!%p1307_p7)
}
  0x88   :  { %s1403_s4 = smov 64   ;;  %s1404_s14 = smov 4  }
  0x89   :  { %97 = dma.hbm_to_vmem [thread:$0]  %s1650_s6, 1024, %s92_s11, [#allocation12], %s1403_s4, %s1403_s4, %s1404_s14  }
  0x8a   :  { %s1405_s0 = smov [#allocation16]   ;;  %s1406_s23 = smov [#allocation17]  }
  0x8b   :  { %s113_s15 = sshll.u32 %s1405_s0, 4  ;;  %s126_s24 = sshll.u32 %s1406_s23, 4  ;;  %s114_s15 = int_to_ptr.vmem [resolvable:$true] %s113_s15  ;;  %s127_s24 = int_to_ptr.vmem [resolvable:$true] %s126_s24 }
  0x8c   :  { %s1311_s27 = scalar_lea.hbm %s1652_s8, 2048 }
  0x8d   :  { %p1312_p8 = scmp.ne.s32.totalorder %s1652_s8, %s1311_s27  ;;  %p1315_p9 = scmp.lt.u32.totalorder %s1311_s27, %s1652_s8 }
  0x8f   :  { %p1317_p10 = pnand %p1315_p9, %p1312_p8 }
  0x91   :  { %1320 = shalt.err (!%p1317_p10)
}
  0x92   :  { %s1321_s6 = scalar_lea.vmem %s114_s15, 2048  ;;  %p1326_p12 = scmp.lt.s32.totalorder %s114_s15, %s114_s15 }
  0x93   :  { %p1322_p11 = scmp.ne.s32.totalorder %s114_s15, %s1321_s6  ;;  %p1327_p13 = scmp.lt.s32.totalorder %s1321_s6, %s1321_s6 }
  0x95   :  { %p1328_p0 = por %p1327_p13, %p1326_p12 }
  0x97   :  { %p1329_p1 = pnand %p1328_p0, %p1322_p11 }
  0x99   :  { %1332 = shalt.err (!%p1329_p1)
}
  0x9a   :  { %119 = dma.hbm_to_vmem [thread:$0]  %s1652_s8, 2048, %s114_s15, [#allocation15], %s1403_s4, %s1403_s4, %s1404_s14  }
  0x9b   :  { %s1333_s12 = scalar_lea.hbm %s1653_s9, 16 }
  0x9c   :  { %p1334_p2 = scmp.ne.s32.totalorder %s1653_s9, %s1333_s12  ;;  %p1337_p3 = scmp.lt.u32.totalorder %s1333_s12, %s1653_s9 }
  0x9e   :  { %p1339_p4 = pnand %p1337_p3, %p1334_p2 }
  0xa0   :  { %1342 = shalt.err (!%p1339_p4)
}
  0xa1   :  { %s1343_s19 = scalar_lea.vmem %s127_s24, 16  ;;  %s1347_s21 = scalar_lea.vmem %s127_s24, 32 }
  0xa2   :  { %p1344_p5 = scmp.ne.s32.totalorder %s127_s24, %s1343_s19  ;;  %p1348_p6 = scmp.lt.s32.totalorder %s127_s24, %s127_s24 }
  0xa3   :  { %p1349_p7 = scmp.lt.s32.totalorder %s1347_s21, %s1343_s19 }
  0xa5   :  { %p1350_p8 = por %p1349_p7, %p1348_p6 }
  0xa7   :  { %p1351_p9 = pnand %p1350_p8, %p1344_p5 }
  0xa9   :  { %1354 = shalt.err (!%p1351_p9)
}
  0xaa   :  { %129 = dma.hbm_to_vmem [thread:$0]  %s1653_s9, 16, %s127_s24, [#allocation18]  }
  0xab   :  { %1377 = dma.done.wait [#allocation3], 64  }
  0xac   :  { %1378 = vsyncadd [#allocation3], 4294967232 }
  0xad   :  { %1379 = dma.done.wait [#allocation6], 256  }
  0xae   :  { %1380 = vsyncadd [#allocation6], 4294967040 }
  0xaf   :  { %1381 = dma.done.wait [#allocation9], 544  }
  0xb0   :  { %1382 = vsyncadd [#allocation9], 4294966752 }
  0xb1   :  { %1383 = dma.done.wait [#allocation12], 4096  }
  0xb2   :  { %1384 = vsyncadd [#allocation12], 4294963200 }
  0xb3   :  { %1385 = dma.done.wait [#allocation15], 2064  }
  0xb4   :  { %1386 = vsyncadd [#allocation15], 4294965232 }
  0xb5   :  { %1387 = dma.done.wait [#allocation18], 16  }
  0xb6   :  { %1388 = vsyncadd [#allocation18], 4294967280  ;;  %v1407_v0 = vmov 0   ;;  %v1408_v1 = vmov 0.0   ;;  %v163_v2 = vld [vmem:[#allocation5] sm:$0xff]  ;;  %vm1409_vm0 = vmmov 0   ;;  %v161_v28 = vlaneseq }
  0xb7   :  { %1062 = vset.pattern.permute.xlu0 %v1407_v0  ;;  %993 = vmatprep.subr.bf16.mxu1 %v1408_v1  ;;  %v1063_v3 = vld [vmem:[#allocation11 + $0x4] ss:$12 sps:$4 sm:$0xff]   ;;  %v1065_v4 = vld [vmem:[#allocation11] ss:$12 sps:$4 sm:$0xff]   ;;  %v1066_v5 = vld [vmem:[#allocation11 + $0x8] ss:$12 sps:$4 sm:$0xff]  }
  0xb8   :  { %363 = vmatprep.mubr.bf16.mxu0 %v1407_v0  ;;  %165 = vperm.xlu0 %1062, %v163_v2   ;;  %v1067_v6 = vld [vmem:[#allocation11 + $0x1c] ss:$12 sps:$4 sm:$0xff]   ;;  %v1069_v7 = vld [vmem:[#allocation11 + $0x18] ss:$12 sps:$4 sm:$0xff]   ;;  %v1070_v8 = vld [vmem:[#allocation11 + $0x20] ss:$12 sps:$4 sm:$0xff]  }
  0xb9   :  { %331 = vmatprep.subr.bf16.mxu0 %v1063_v3  ;;  %1009 = vmatprep.mubr.msk.bf16.mxu1 %vm1409_vm0, %v1408_v1  ;;  %v1071_v9 = vld [vmem:[#allocation11 + $0x34] ss:$12 sps:$4 sm:$0xff]   ;;  %v1073_v10 = vld [vmem:[#allocation11 + $0x30] ss:$12 sps:$4 sm:$0xff]   ;;  %v1074_v11 = vld [vmem:[#allocation11 + $0x38] ss:$12 sps:$4 sm:$0xff]  }
  0xba   :  { %332 = vmatpush1.bf16.msra.mxu0 %v1065_v4  ;;  %994 = vmatpush3.bf16.msra.mxu1 %v1066_v5  ;;  %v1075_v12 = vld [vmem:[#allocation11 + $0x4c] ss:$12 sps:$4 sm:$0xff]   ;;  %v1077_v13 = vld [vmem:[#allocation11 + $0x48] ss:$12 sps:$4 sm:$0xff]   ;;  %v1078_v14 = vld [vmem:[#allocation11 + $0x50] ss:$12 sps:$4 sm:$0xff]  }
  0xbb   :  { %333 = vmatprep.subr.bf16.mxu0 %v1067_v6  ;;  %995 = vmatprep.subr.bf16.mxu1 %v1408_v1  ;;  %v1079_v15 = vld [vmem:[#allocation11 + $0x64] ss:$12 sps:$4 sm:$0xff]   ;;  %v1081_v16 = vld [vmem:[#allocation11 + $0x60] ss:$12 sps:$4 sm:$0xff]   ;;  %v1082_v17 = vld [vmem:[#allocation11 + $0x68] ss:$12 sps:$4 sm:$0xff]  }
  0xbc   :  { %v1083_v18 = vld [vmem:[#allocation11 + $0x7c] ss:$12 sps:$4 sm:$0xff]   ;;  %v1085_v19 = vld [vmem:[#allocation11 + $0x78] ss:$12 sps:$4 sm:$0xff]   ;;  %v1086_v20 = vld [vmem:[#allocation11 + $0x80] ss:$12 sps:$4 sm:$0xff]  }
  0xbd   :  { %v1087_v21 = vld [vmem:[#allocation11 + $0x94] ss:$12 sps:$4 sm:$0xff]   ;;  %v1089_v22 = vld [vmem:[#allocation11 + $0x90] ss:$12 sps:$4 sm:$0xff]   ;;  %v1090_v23 = vld [vmem:[#allocation11 + $0x98] ss:$12 sps:$4 sm:$0xff]  }
  0xbe   :  { %334 = vmatpush1.bf16.msra.mxu0 %v1069_v7  ;;  %996 = vmatpush3.bf16.msra.mxu1 %v1070_v8  ;;  %v1091_v24 = vld [vmem:[#allocation11 + $0xac] ss:$12 sps:$4 sm:$0xff]   ;;  %v1093_v25 = vld [vmem:[#allocation11 + $0xa8] ss:$12 sps:$4 sm:$0xff]   ;;  %v1094_v26 = vld [vmem:[#allocation11 + $0xb0] ss:$12 sps:$4 sm:$0xff]  }
  0xbf   :  { %335 = vmatprep.subr.bf16.mxu0 %v1071_v9  ;;  %997 = vmatprep.subr.bf16.mxu1 %v1408_v1  ;;  %v1097_v27 = vld [vmem:[#allocation8 + $0x4] ss:$8 sps:$4 sm:$0xff]   ;;  %v162_v29 = vand.u32 127, %v161_v28  ;;  %v1095_v31 = vld [vmem:[#allocation8] ss:$8 sps:$4 sm:$0xff]   ;;  %vm437_vm3 = vcmask 261120  }
  0xc0   :  { %v1100_v32 = vld [vmem:[#allocation8 + $0x14] ss:$8 sps:$4 sm:$0xff]   ;;  %v1101_v33 = vld [vmem:[#allocation13] sm:$0xff]   ;;  %v1410_v34 = vmov 1.0|1.0   ;;  %v1102_v36 = vld [vmem:[#allocation13 + $0x8] sm:$0xff]  }
  0xc1   :  { %v1098_v35 = vld [vmem:[#allocation8 + $0x10] ss:$8 sps:$4 sm:$0xff]   ;;  %v412_v37 = vld [vmem:[#allocation2] sm:$0xf]  ;;  %v1105_v40 = vld [vmem:[#allocation13 + $0x20] sm:$0xff]   ;;  %v485_v56 = vshrl.u32 %v161_v28, 7 }
  0xc2   :  { %336 = vmatpush1.bf16.msra.mxu0 %v1073_v10  ;;  %998 = vmatpush3.bf16.msra.mxu1 %v1074_v11  ;;  %v1103_v38 = vld [vmem:[#allocation13 + $0x10] sm:$0xff]   ;;  %v1104_v39 = vld [vmem:[#allocation13 + $0x18] sm:$0xff]   ;;  %v1106_v41 = vld [vmem:[#allocation13 + $0x28] sm:$0xff]   ;;  %s1411_s9 = smov 16   ;;  %s1412_s4 = smov 17   ;;  %vm810_vm6 = vcmask 130048  }
  0xc3   :  { %337 = vmatprep.subr.bf16.mxu0 %v1075_v12  ;;  %999 = vmatprep.subr.bf16.mxu1 %v1408_v1  ;;  %v1107_v42 = vld [vmem:[#allocation13 + $0x30] sm:$0xff]   ;;  %v1108_v43 = vld [vmem:[#allocation13 + $0x38] sm:$0xff]   ;;  %v1109_v44 = vld [vmem:[#allocation16 + $0x40] sm:$0xff]   ;;  %v490_v3 = vsub.s32 1, %v485_v56  ;;  %s1413_s14 = smov 112   ;;  %s1414_s5 = smov 127  }
  0xc4   :  { %v1110_v45 = vld [vmem:[#allocation16] sm:$0xff]   ;;  %v1111_v46 = vld [vmem:[#allocation16 + $0x48] sm:$0xff]   ;;  %v1113_v48 = vld [vmem:[#allocation16 + $0x50] sm:$0xff]   ;;  %s1415_s20 = smov 32   ;;  %s1416_s0 = smov 35   ;;  %vm860_vm7 = vcmask 392192  }
  0xc5   :  { %v1112_v47 = vld [vmem:[#allocation16 + $0x8] sm:$0xff]   ;;  %v1114_v49 = vld [vmem:[#allocation16 + $0x10] sm:$0xff]   ;;  %v1115_v50 = vld [vmem:[#allocation16 + $0x58] sm:$0xff]   ;;  %s1417_s15 = smov 48   ;;  %s1418_s23 = smov 34   ;;  %vm862_vm8 = vcmask 523264  }
  0xc6   :  { %338 = vmatpush1.bf16.msra.mxu0 %v1077_v13  ;;  %1000 = vmatpush3.bf16.msra.mxu1 %v1078_v14  ;;  %v1116_v51 = vld [vmem:[#allocation16 + $0x18] sm:$0xff]   ;;  %v1117_v52 = vld [vmem:[#allocation16 + $0x60] sm:$0xff]   ;;  %v1119_v54 = vld [vmem:[#allocation16 + $0x68] sm:$0xff]   ;;  %vm864_vm9 = vcmask 531456   ;;  %vm866_vm10 = vcmask 539648   ;;  %vm868_vm11 = vcmask 547840  }
  0xc7   :  { %339 = vmatprep.subr.bf16.mxu0 %v1079_v15  ;;  %1001 = vmatprep.subr.bf16.mxu1 %v1408_v1  ;;  %v1118_v53 = vld [vmem:[#allocation16 + $0x20] sm:$0xff]   ;;  %v1120_v55 = vld [vmem:[#allocation16 + $0x28] sm:$0xff]   ;;  %v482_v2 = vld [vmem:[#allocation10] sm:$0x3]  ;;  %s1419_s24 = smov [#allocation19]   ;;  %vm870_vm12 = vcmask 556032  }
  0xc8   :  { %v491_v6 = vrot.slane %v482_v2, %v490_v3  ;;  %s879_s25 = sshll.u32 %s1419_s24, 4  ;;  %s880_s25 = int_to_ptr.vmem [resolvable:$true] %s879_s25 }
  0xc9   :  { %s1355_s26 = scalar_lea.vmem %s880_s25, 128  ;;  %p1360_p11 = scmp.lt.s32.totalorder %s880_s25, %s880_s25 }
  0xca   :  { %340 = vmatpush1.bf16.msra.mxu0 %v1081_v16  ;;  %1002 = vmatpush3.bf16.msra.mxu1 %v1082_v17  ;;  %p1356_p10 = scmp.ne.s32.totalorder %s880_s25, %s1355_s26  ;;  %p1361_p12 = scmp.lt.s32.totalorder %s1355_s26, %s1355_s26 }
  0xcb   :  { %341 = vmatprep.subr.bf16.mxu0 %v1083_v18  ;;  %1003 = vmatprep.subr.bf16.mxu1 %v1408_v1  ;;  %v1121_v18 = vld [vmem:[#allocation16 + $0x70] sm:$0xff]  }
  0xcc   :  { %p1362_p13 = por %p1361_p12, %p1360_p11 }
  0xce   :  { %342 = vmatpush1.bf16.msra.mxu0 %v1085_v19  ;;  %1004 = vmatpush3.bf16.msra.mxu1 %v1086_v20  ;;  %v1122_v19 = vld [vmem:[#allocation16 + $0x30] sm:$0xff]   ;;  %v1123_v20 = vld [vmem:[#allocation16 + $0x78] sm:$0xff]   ;;  %p1363_p0 = pnand %p1362_p13, %p1356_p10 }
  0xcf   :  { %343 = vmatprep.subr.bf16.mxu0 %v1087_v21  ;;  %1005 = vmatprep.subr.bf16.mxu1 %v1408_v1  ;;  %v1124_v21 = vld [vmem:[#allocation16 + $0x38] sm:$0xff]  }
  0xd2   :  { %344 = vmatpush1.bf16.msra.mxu0 %v1089_v22  ;;  %1006 = vmatpush3.bf16.msra.mxu1 %v1090_v23  ;;  %v799_v22 = vld [vmem:[#allocation7] sm:$0xff] }
  0xd3   :  { %345 = vmatprep.subr.bf16.mxu0 %v1091_v24  ;;  %1007 = vmatprep.subr.bf16.mxu1 %v1408_v1  ;;  %v935_v24 = vld [vmem:[#allocation14] ss:$0 sm:$0xff] }
  0xd4   :  { %801 = vrot.lane.b32.xlu0 %v799_v22, %s1411_s9 }
  0xd6   :  { %346 = vmatpush1.bf16.msra.mxu0 %v1093_v25  ;;  %1008 = vmatpush3.bf16.msra.mxu1 %v1094_v26 }
  0xd7   :  { %441 = vmatprep.subr.bf16.mxu0 %v1097_v27  ;;  %1013 = vmatprep.subr.bf16.mxu1 %v1408_v1 }
  0xd8   :  { %822 = vrot.lane.b32.xlu0 %v799_v22, %s1412_s4 }
 0x137   :  { %v166_v30 = vpop.permute.xlu0 %165 }
 0x138   :  { %vm167_vm1 = vcmp.eq.s32.totalorder %v162_v29, %v166_v30 }
 0x139   :  { %vm918_vm2 = vmpackc.low %vm167_vm1, %vm167_vm1 }
 0x13a   :  { %919 = vmatmul.mubr.msk.bf16.vlgmr.msra.gmra.mrb[0].mxu0 %vm918_vm2, %v1410_v34  ;;  %1010 = vmatmul.mubr.msk.bf16.vlgmr.msra.gmra.mrb[0].mxu1 %vm918_vm2, %v1410_v34 }
 0x13b   :  { %442 = vmatpush1.bf16.msra.mxu0 %v1095_v31  ;;  %473 = vmatprep.mubr.bf16.mxu0 %v1407_v0 }
 0x13c   :  { %443 = vmatprep.subr.bf16.mxu0 %v1100_v32  ;;  %1014 = vmatpush3.bf16.msra.mxu1 %v1101_v33  ;;  %v936_v33 = vld [vmem:[#allocation17] ss:$0 sm:$0xff] }
 0x13d   :  { %1015 = vmatprep.subr.bf16.mxu1 %v1408_v1  ;;  %1029 = vmatprep.mubr.msk.bf16.mxu1 %vm1409_vm0, %v1408_v1 }
 0x13f   :  { %444 = vmatpush1.bf16.msra.mxu0 %v1098_v35 }
 0x140   :  { %1016 = vmatpush3.bf16.msra.mxu1 %v1102_v36  ;;  %971 = vmatprep.subr.bf16.mxu0 %v1109_v44 }
 0x141   :  { %1017 = vmatprep.subr.bf16.mxu1 %v1408_v1 }
 0x142   :  { %926 = vmatmul.mubr.msk.bf16.vlgmr.msra.gmra.mrb[4].mxu0 %vm437_vm3, %v412_v37 }
 0x143   :  { %972 = vmatpush3.bf16.msra.mxu0 %v1110_v45 }
 0x144   :  { %1018 = vmatpush3.bf16.msra.mxu1 %v1103_v38  ;;  %973 = vmatprep.subr.bf16.mxu0 %v1111_v46 }
 0x145   :  { %1019 = vmatprep.subr.bf16.mxu1 %v1408_v1 }
 0x147   :  { %974 = vmatpush3.bf16.msra.mxu0 %v1112_v47  ;;  %v802_v47 = vpop.permute.xlu0 %801 }
 0x148   :  { %1020 = vmatpush3.bf16.msra.mxu1 %v1104_v39  ;;  %975 = vmatprep.subr.bf16.mxu0 %v1113_v48 }
 0x149   :  { %1021 = vmatprep.subr.bf16.mxu1 %v1408_v1 }
 0x14b   :  { %976 = vmatpush3.bf16.msra.mxu0 %v1114_v49 }
 0x14c   :  { %1022 = vmatpush3.bf16.msra.mxu1 %v1105_v40  ;;  %977 = vmatprep.subr.bf16.mxu0 %v1115_v50 }
 0x14d   :  { %1023 = vmatprep.subr.bf16.mxu1 %v1408_v1 }
 0x14f   :  { %978 = vmatpush3.bf16.msra.mxu0 %v1116_v51 }
 0x150   :  { %1024 = vmatpush3.bf16.msra.mxu1 %v1106_v41  ;;  %979 = vmatprep.subr.bf16.mxu0 %v1117_v52  ;;  %v823_v52 = vpop.permute.xlu0 %822 }
 0x151   :  { %1025 = vmatprep.subr.bf16.mxu1 %v1408_v1 }
 0x153   :  { %980 = vmatpush3.bf16.msra.mxu0 %v1118_v53 }
 0x154   :  { %1026 = vmatpush3.bf16.msra.mxu1 %v1107_v42  ;;  %981 = vmatprep.subr.bf16.mxu0 %v1119_v54 }
 0x155   :  { %1027 = vmatprep.subr.bf16.mxu1 %v1408_v1  ;;  %v486_v1 = vsub.s32 0, %v485_v56 }
 0x157   :  { %982 = vmatpush3.bf16.msra.mxu0 %v1120_v55  ;;  %v487_v4 = vrot.slane %v482_v2, %v486_v1 }
 0x158   :  { %1028 = vmatpush3.bf16.msra.mxu1 %v1108_v43  ;;  %983 = vmatprep.subr.bf16.mxu0 %v1121_v18 }
 0x15b   :  { %984 = vmatpush3.bf16.msra.mxu0 %v1122_v19 }
 0x15c   :  { %985 = vmatprep.subr.bf16.mxu0 %v1123_v20 }
 0x15f   :  { %986 = vmatpush3.bf16.msra.mxu0 %v1124_v21 }
 0x20d   :  { %v365_v57 = vpop.f32.mrb[0].mxu0  ;;  %v406_v58 = vpop.f32.mrb[0].mxu1 }
 0x20e   :  { %v367_v59 = vpop.f32.mrb[1].mxu0  ;;  %v1011_v60 = vpop.f32.mrb[1].mxu1 }
 0x20f   :  { %v369_v61 = vpop.f32.mrb[2].mxu0  ;;  %v409_v62 = vpop.f32.mrb[2].mxu1 }
 0x210   :  { %v370_v63 = vpop.f32.mrb[3].mxu0  ;;  %v1012_v0 = vpop.f32.mrb[3].mxu1 }
 0x215   :  { %v475_v5 = vpop.f32.mrb[4].mxu0 }
 0x216   :  { %v476_v7 = vadd.f32 %v475_v5, %v365_v57  ;;  %v477_v8 = vpop.f32.mrb[5].mxu0 }
 0x217   :  { %v478_v9 = vadd.f32 %v477_v8, %v367_v59  ;;  %v479_v10 = vpop.f32.mrb[6].mxu0 }
 0x218   :  { %v494_v11 = vadd.f32 %v487_v4, %v476_v7  ;;  %v480_v12 = vpop.f32.mrb[7].mxu0 }
 0x219   :  { %v495_v13 = vadd.f32 %v491_v6, %v478_v9 }
 0x21a   :  { %v496_v14 = vmax.f32 %v494_v11, 0.0 }
 0x21b   :  { %v497_v15 = vmax.f32 %v495_v13, 0.0 }
 0x21c   :  { %v498_v16 = vpack.c.bf16 %v496_v14, %v496_v14 }
 0x21d   :  { %v613_v17 = vpack.c.bf16 %v497_v15, %v497_v15 }
 0x21e   :  { %1030 = vmatmul.mubr.bf16.vlgmr.msra.gmra.mrb[4].mxu1 %v498_v16 }
 0x21f   :  { %781 = vmatprep.mubr.bf16.mxu0 %v613_v17 }
 0x2f1   :  { %v597_v23 = vpop.f32.mrb[4].mxu1 }
 0x2f2   :  { %v598_v25 = vadd.f32 %v597_v23, %v406_v58  ;;  %v1031_v26 = vpop.f32.mrb[5].mxu1 }
 0x2f3   :  { %v600_v27 = vpop.f32.mrb[6].mxu1 }
 0x2f4   :  { %v610_v28 = vadd.f32 %v935_v24, %v598_v25  ;;  %v1032_v29 = vpop.f32.mrb[7].mxu1 }
 0x2f6   :  { %v611_v30 = vmax.f32 %v610_v28, 0.0 }
 0x2f8   :  { %v612_v31 = vpack.c.bf16 %v611_v30, %v611_v30 }
 0x2fa   :  { %782 = vmatmul.mubr.bf16.vlgmr.msra.gmra.mrb[8].mxu0 %v612_v31 }
 0x3cd   :  { %v987_v32 = vpop.f32.mrb[8].mxu0 }
 0x3ce   :  { %v988_v34 = vpop.f32.mrb[9].mxu0 }
 0x3cf   :  { %v989_v35 = vadd.f32 %v988_v34, %v987_v32  ;;  %v990_v36 = vpop.f32.mrb[10].mxu0 }
 0x3d0   :  { %v991_v37 = vpop.f32.mrb[11].mxu0 }
 0x3d1   :  { %v784_v38 = vadd.f32 %v989_v35, %v936_v33 }
 0x3d3   :  { %v789_v39 = vmul.f32 1.442695, %v784_v38 }
 0x3d5   :  { %1125 = vpow2.f32 %v789_v39 }
 0x3df   :  { %v1126_v40 = vpop.eup %1125 }
 0x3e0   :  { %v791_v41 = vadd.f32 0.0001, %v1126_v40 }
 0x3e2   :  { %1127 = vrsqrt.f32 %v791_v41  ;;  %vm794_vm4 = vcmp.eq.f32.partialorder %v791_v41, inf  ;;  %v797_v44 = vand.u32 2147483648, %v791_v41  ;;  %vm796_vm5 = vcmp.eq.f32.partialorder %v791_v41, 0.0 }
 0x3e3   :  { %v858_v5 = vsel %vm810_vm6, %v784_v38, %v791_v41 }
 0x3ec   :  { %v1128_v42 = vpop.eup %1127 }
 0x3ed   :  { %v793_v43 = vmul.f32 %v1128_v42, %v791_v41 }
 0x3ef   :  { %v795_v45 = vsel %vm794_vm4, %v791_v41, %v793_v43 }
 0x3f0   :  { %v798_v46 = vsel %vm796_vm5, %v797_v44, %v795_v45 }
 0x3f1   :  { %v804_v48 = vmul.f32 %v802_v47, %v798_v46  ;;  %v825_v53 = vmul.f32 %v823_v52, %v798_v46 }
 0x3f3   :  { %806 = vrot.lane.b32.xlu1 %v804_v48, %s1413_s14 }
 0x465   :  { %v807_v49 = vpop.permute.xlu1 %806 }
 0x466   :  { %v809_v50 = vadd.f32 %v807_v49, %v784_v38 }
 0x468   :  { %v811_v51 = vsel %vm810_vm6, %v809_v50, -inf }
 0x469   :  { %812 = vmax.xlane.f32.xlu1 %v811_v51 }
 0x47a   :  { %827 = vrot.lane.b32.xlu1 %v825_v53, %s1414_s5 }
 0x47e   :  { %843 = vrot.lane.b32.xlu1 %v784_v38, %s1415_s20 }
 0x4f6   :  { %v813_v54 = vpop.xlane.xlu1 %812 }
 0x4f7   :  { %v814_v55 = vsub.f32 %v809_v50, %v813_v54 }
 0x4f9   :  { %v815_v56 = vmul.f32 1.442695, %v814_v55 }
 0x4fa   :  { %v828_v59 = vpop.permute.xlu1 %827 }
 0x4fb   :  { %1129 = vpow2.f32 %v815_v56  ;;  %v830_v60 = vadd.f32 %v828_v59, %v784_v38 }
 0x4fd   :  { %v831_v61 = vmin.f32 %v830_v60, 15.0 }
 0x4fe   :  { %v844_v4 = vpop.permute.xlu1 %843 }
 0x4ff   :  { %v832_v62 = vmul.f32 1.442695, %v831_v61 }
 0x501   :  { %1131 = vpow2.f32 %v832_v62 }
 0x505   :  { %v1130_v57 = vpop.eup %1129 }
 0x506   :  { %v817_v58 = vsel %vm810_vm6, %v1130_v57, 0.0 }
 0x507   :  { %818 = vadd.xlane.f32.xlu0 %v817_v58 }
 0x50b   :  { %v1132_v63 = vpop.eup %1131 }
 0x51d   :  { %835 = vrot.lane.b32.xlu0 %v809_v50, %s1415_s20 }
 0x521   :  { %847 = vrot.lane.b32.xlu0 %v791_v41, %s1415_s20 }
 0x525   :  { %855 = vrot.lane.b32.xlu0 %v1132_v63, %s1416_s0 }
 0x594   :  { %v819_v0 = vpop.xlane.xlu0 %818 }
 0x595   :  { %1133 = vrcp.f32 %v819_v0 }
 0x598   :  { %v836_v3 = vpop.permute.xlu0 %835 }
 0x599   :  { %v859_v7 = vsel %vm437_vm3, %v858_v5, %v836_v3 }
 0x59c   :  { %v848_v6 = vpop.permute.xlu0 %847 }
 0x59f   :  { %v1134_v1 = vpop.eup %1133 }
 0x5a0   :  { %v821_v2 = vmul.f32 %v1134_v1, %v1130_v57  ;;  %v856_v13 = vpop.permute.xlu0 %855 }
 0x5a2   :  { %839 = vrot.lane.b32.xlu1 %v821_v2, %s1417_s15 }
 0x5a6   :  { %851 = vrot.lane.b32.xlu1 %v831_v61, %s1418_s23 }
 0x614   :  { %v840_v8 = vpop.permute.xlu1 %839 }
 0x615   :  { %v861_v9 = vsel %vm860_vm7, %v859_v7, %v840_v8 }
 0x616   :  { %v863_v10 = vsel %vm862_vm8, %v861_v9, %v844_v4 }
 0x617   :  { %v865_v11 = vsel %vm864_vm9, %v863_v10, %v848_v6 }
 0x618   :  { %v852_v12 = vpop.permute.xlu1 %851 }
 0x619   :  { %v867_v14 = vsel %vm866_vm10, %v865_v11, %v852_v12 }
 0x61a   :  { %v869_v15 = vsel %vm868_vm11, %v867_v14, %v856_v13 }
 0x61b   :  { %v871_v16 = vsel %vm870_vm12, %v869_v15, 0.0 }
 0x61c   :  { %872 = vst [vmem:[#allocation19] sm:$0xff] %v871_v16 }
 0x61d   :  { %1366 = shalt.err (!%p1363_p0)
}
 0x61e   :  { %s1367_s3 = scalar_lea.hbm %s1654_s10, 128 }
 0x61f   :  { %p1368_p1 = scmp.ne.s32.totalorder %s1654_s10, %s1367_s3  ;;  %p1371_p2 = scmp.lt.u32.totalorder %s1367_s3, %s1654_s10 }
 0x621   :  { %p1373_p3 = pnand %p1371_p2, %p1368_p1 }
 0x623   :  { %1376 = shalt.err (!%p1373_p3)
}
 0x624   :  { %882 = dma.vmem_to_hbm [thread:$0]  %s880_s25, 128, %s1654_s10, [#allocation4]  }
 0x625   :  { %1389 = dma.done.wait [#allocation4], 128  }
 0x626   :  { %1390 = vsyncadd [#allocation4], 4294967168 }
 0x627   :  { %886 = vsyncpa [#allocation3], 1 }
 0x628   :  { %887 = vsyncpa [#allocation6], 1 }
 0x629   :  { %888 = vsyncpa [#allocation9], 1 }
 0x62a   :  { %889 = vsyncpa [#allocation12], 1 }
 0x62b   :  { %890 = vsyncpa [#allocation15], 1 }
 0x62c   :  { %891 = vsyncpa [#allocation18], 1 }
 0x62d   :  { %892 = vsyncpa [#allocation4], 1 }

</bundles_post_ra>
